<compile_context>
chip_gen: v7x
topology: tpu7x:2x2x1
jax: 0.10.0
libtpu: 0.0.40
codegen_flags: <defaults>
</compile_context>

<pallas_src>
import math

import jax
import jax.numpy as jnp
from jax.experimental import pallas as pl
from jax.experimental.pallas import tpu as pltpu


def _round_up(n, m):
    return ((n + m - 1) // m) * m


def mlp_kernel(x_ref, w1_ref, b1_ref, w2_ref, b2_ref, o_ref):
    # layer1: x @ W1 + b1, ReLU.  MXU matmul with f32 accumulation; the cast is
    # a no-op for f32 weights and the intended downcast when weights are bf16.
    x = x_ref[...]
    h = jnp.dot(x.astype(w1_ref.dtype), w1_ref[...],
                preferred_element_type=jnp.float32)
    h = jnp.maximum(h + b1_ref[...], 0.0)           # bias/ReLU stay f32 (VPU)

    # layer2: h @ W2 + b2, Sigmoid (EUP), all elementwise math in f32.
    y = jnp.dot(h.astype(w2_ref.dtype), w2_ref[...],
                preferred_element_type=jnp.float32)
    o_ref[...] = jax.nn.sigmoid(y + b2_ref[...]).astype(o_ref.dtype)


def prepare_params(w1, b1, w2, b2, *, mxu_dtype=jnp.float32):
    """One-time conversion of PyTorch-layout params to kernel layout.

    w1: (H, C), b1: (H,), w2: (C, H), b2: (C,)  ->
    w1_t: (C, H), b1_r: (1, H), w2_t: (H, C), b2_r: (1, C)
    (no feature padding: the MXU handles unpadded K/N and the output store
    uses a full-extent last dim, so the math and shapes are unchanged).
    """
    H, C = w1.shape
    w1_t = w1.T.astype(mxu_dtype)                    # (C, H)
    w2_t = w2.T.astype(mxu_dtype)                    # (H, C)
    b1_r = b1.reshape(1, H).astype(jnp.float32)
    b2_r = b2.reshape(1, C).astype(jnp.float32)
    return w1_t, b1_r, w2_t, b2_r


def mlp_forward(x, params, *, tile_b=512):
    """x: (B, C) f32; params from prepare_params (already transposed to (in, out))."""
    w1_t, b1_r, w2_t, b2_r = params
    B, C = x.shape
    _, H = w1_t.shape

    # --- batch tile selection -------------------------------------------------
    # Multiple of 8 sublanes; large enough to amortize the ~0.35us per-step
    # overhead; capped so (a) the grid has >= ~4 steps for v7x's two
    # TensorCores, (b) double-buffered x/out tiles fit comfortably in VMEM.
    tile_b = max(8, _round_up(min(tile_b, B), 8))
    tile_b = min(tile_b, _round_up(pl.cdiv(B, 4), 8))          # >= ~4 grid steps
    act_budget = 24 << 20                                       # x+out, 2x buffered
    max_rows = max(8, (act_budget // (4 * C * x.dtype.itemsize) // 8) * 8)
    tile_b = min(tile_b, max_rows)

    grid = (pl.cdiv(B, tile_b),)   # partial last block is masked by Pallas

    itemsize = lambda a: a.size * a.dtype.itemsize
    cost = pl.CostEstimate(
        flops=4 * B * H * C,                         # two matmuls: 2*M*N*K each
        transcendentals=B * C,                       # sigmoid
        bytes_accessed=(2 * itemsize(x) + itemsize(w1_t) + itemsize(w2_t)
                        + itemsize(b1_r) + itemsize(b2_r)),
    )

    vmem_limit = int(
        2 * 2 * tile_b * C * x.dtype.itemsize        # x + out tiles, 2x buffered
        + 2 * (itemsize(w1_t) + itemsize(w2_t) + itemsize(b1_r) + itemsize(b2_r))
        + (4 << 20))                                 # headroom for internal scratch
    vmem_limit = min(max(vmem_limit, 16 << 20), 64 << 20)

    return pl.pallas_call(
        mlp_kernel,
        out_shape=jax.ShapeDtypeStruct((B, C), x.dtype),
        grid=grid,
        in_specs=[
            pl.BlockSpec((tile_b, C), lambda i: (i, 0)),   # x tile (pipelined)
            pl.BlockSpec((C, H), lambda i: (0, 0)),        # w1_t (resident)
            pl.BlockSpec((1, H), lambda i: (0, 0)),        # b1   (resident)
            pl.BlockSpec((H, C), lambda i: (0, 0)),        # w2_t (resident)
            pl.BlockSpec((1, C), lambda i: (0, 0)),        # b2   (resident)
        ],
        out_specs=pl.BlockSpec((tile_b, C), lambda i: (i, 0)),
        compiler_params=pltpu.CompilerParams(
            dimension_semantics=("parallel",),
            vmem_limit_bytes=vmem_limit),
        cost_estimate=cost,
    )(x, w1_t, b1_r, w2_t, b2_r)


def init_params(key, input_channels, hidden=256, dtype=jnp.float32):
    """Deterministic init mimicking PyTorch nn.Linear default (uniform +-1/sqrt(fan_in))."""
    k1, k2, k3, k4 = jax.random.split(key, 4)
    bound1 = 1.0 / math.sqrt(input_channels)
    bound2 = 1.0 / math.sqrt(hidden)
    w1 = jax.random.uniform(k1, (hidden, input_channels), dtype, -bound1, bound1)
    b1 = jax.random.uniform(k2, (hidden,), dtype, -bound1, bound1)
    w2 = jax.random.uniform(k3, (input_channels, hidden), dtype, -bound2, bound2)
    b2 = jax.random.uniform(k4, (input_channels,), dtype, -bound2, bound2)
    return w1, b1, w2, b2


if __name__ == "__main__":
    key = jax.random.PRNGKey(0)
    kx, kp = jax.random.split(key)

    batch = 8
    input_channels = 32

    x = jax.random.normal(kx, (batch, input_channels), jnp.float32)
    w1, b1, w2, b2 = init_params(kp, input_channels)

    # Plain-JAX reference (same math as the PyTorch module).
    ref = jax.nn.sigmoid(jnp.maximum(x @ w1.T + b1, 0.0) @ w2.T + b2)

    fwd = jax.jit(mlp_forward)

    # f32 MXU path: strict tolerance check.
    params_f32 = prepare_params(w1, b1, w2, b2, mxu_dtype=jnp.float32)
    out = jax.block_until_ready(fwd(x, params_f32))
    assert out.shape == (batch, input_channels)
    assert jnp.allclose(out, ref, atol=1e-5, rtol=1e-5)

    # bf16 MXU-feed path (recommended default on v5e; throughput mode on
    # v6e/v7x).  Activations/bias/ReLU/sigmoid stay f32: loose check.
    params_bf16 = prepare_params(w1, b1, w2, b2, mxu_dtype=jnp.bfloat16)
    out_bf16 = jax.block_until_ready(fwd(x, params_bf16))
    assert out_bf16.shape == (batch, input_channels)
    assert jnp.allclose(out_bf16, ref, atol=5e-2)

    # Odd / non-multiple-of-tile batch exercises the masked partial last block.
    x_odd = jax.random.normal(kx, (batch + 3, input_channels), jnp.float32)
    ref_odd = jax.nn.sigmoid(jnp.maximum(x_odd @ w1.T + b1, 0.0) @ w2.T + b2)
    out_odd = jax.block_until_ready(jax.jit(mlp_forward)(x_odd, params_f32))
    assert out_odd.shape == x_odd.shape
    assert jnp.allclose(out_odd, ref_odd, atol=1e-5, rtol=1e-5)

    print("KERNEL_OK")
</pallas_src>

<mosaic_0001>
module attributes {stable_mosaic.version = 11 : i64} {
  func.func @mlp_kernel(%arg0: i32, %arg1: memref<8x32xf32, #tpu.memory_space<vmem>>, %arg2: memref<32x256xf32, #tpu.memory_space<vmem>>, %arg3: memref<1x256xf32, #tpu.memory_space<vmem>>, %arg4: memref<256x32xf32, #tpu.memory_space<vmem>>, %arg5: memref<1x32xf32, #tpu.memory_space<vmem>>, %arg6: memref<8x32xf32, #tpu.memory_space<vmem>>) attributes {dimension_semantics = [#tpu.dimension_semantics<parallel>], iteration_bounds = array<i64: 1>, scalar_prefetch = 0 : i64, scratch_operands = 0 : i64, tpu.core_type = #tpu.core_type<tc>, window_params = [{transform_indices = @transform_0, window_bounds = array<i64: 8, 32>}, {pipeline_mode = #tpu.pipeline_mode<synchronous>, transform_indices = @transform_1, window_bounds = array<i64: 32, 256>}, {pipeline_mode = #tpu.pipeline_mode<synchronous>, transform_indices = @transform_2, window_bounds = array<i64: 1, 256>}, {pipeline_mode = #tpu.pipeline_mode<synchronous>, transform_indices = @transform_3, window_bounds = array<i64: 256, 32>}, {pipeline_mode = #tpu.pipeline_mode<synchronous>, transform_indices = @transform_4, window_bounds = array<i64: 1, 32>}, {transform_indices = @transform_5, window_bounds = array<i64: 8, 32>}]} {
    %c0 = arith.constant 0 : index
    %c0_0 = arith.constant 0 : index
    %0 = vector.load %arg1[%c0, %c0_0] : memref<8x32xf32, #tpu.memory_space<vmem>>, vector<8x32xf32>
    %c0_1 = arith.constant 0 : index
    %c0_2 = arith.constant 0 : index
    %1 = vector.load %arg2[%c0_1, %c0_2] : memref<32x256xf32, #tpu.memory_space<vmem>>, vector<32x256xf32>
    %cst = arith.constant dense<0.000000e+00> : vector<8x256xf32>
    %2 = tpu.matmul %0, %1, %cst {dimension_numbers = #tpu.dot_dimension_numbers<[1], [0], [0], [1], [0, 0, 1, 1], [], []>} : vector<8x32xf32>, vector<32x256xf32>, vector<8x256xf32> -> vector<8x256xf32>
    %c0_3 = arith.constant 0 : index
    %c0_4 = arith.constant 0 : index
    %3 = vector.load %arg3[%c0_3, %c0_4] : memref<1x256xf32, #tpu.memory_space<vmem>>, vector<1x256xf32>
    %4 = vector.broadcast %3 : vector<1x256xf32> to vector<8x256xf32>
    %5 = arith.addf %2, %4 : vector<8x256xf32>
    %cst_5 = arith.constant 0.000000e+00 : f32
    %6 = vector.broadcast %cst_5 : f32 to vector<8x256xf32>
    %7 = arith.maximumf %5, %6 : vector<8x256xf32>
    %c0_6 = arith.constant 0 : index
    %c0_7 = arith.constant 0 : index
    %8 = vector.load %arg4[%c0_6, %c0_7] : memref<256x32xf32, #tpu.memory_space<vmem>>, vector<256x32xf32>
    %cst_8 = arith.constant dense<0.000000e+00> : vector<8x32xf32>
    %9 = tpu.matmul %7, %8, %cst_8 {dimension_numbers = #tpu.dot_dimension_numbers<[1], [0], [0], [1], [0, 0, 1, 1], [], []>} : vector<8x256xf32>, vector<256x32xf32>, vector<8x32xf32> -> vector<8x32xf32>
    %c0_9 = arith.constant 0 : index
    %c0_10 = arith.constant 0 : index
    %10 = vector.load %arg5[%c0_9, %c0_10] : memref<1x32xf32, #tpu.memory_space<vmem>>, vector<1x32xf32>
    %11 = vector.broadcast %10 : vector<1x32xf32> to vector<8x32xf32>
    %12 = arith.addf %9, %11 : vector<8x32xf32>
    %13 = arith.negf %12 : vector<8x32xf32>
    %14 = math.exp %13 : vector<8x32xf32>
    %cst_11 = arith.constant 1.000000e+00 : f32
    %15 = vector.broadcast %cst_11 : f32 to vector<8x32xf32>
    %16 = arith.addf %15, %14 : vector<8x32xf32>
    %17 = arith.divf %15, %16 : vector<8x32xf32>
    %c0_12 = arith.constant 0 : index
    %c0_13 = arith.constant 0 : index
    %18 = vector.load %arg6[%c0_12, %c0_13] : memref<8x32xf32, #tpu.memory_space<vmem>>, vector<8x32xf32>
    tpu.vector_store %arg6[%c0_12, %c0_13], %17 {strides = array<i32>} : memref<8x32xf32, #tpu.memory_space<vmem>>, vector<8x32xf32>,
    return
  }
  func.func @transform_0(%arg0: i32) -> (i32, i32) {
    %c0_i32 = arith.constant 0 : i32
    %c0_i32_0 = arith.constant 0 : i32
    return %arg0, %c0_i32 : i32, i32
  }
  func.func @transform_1(%arg0: i32) -> (i32, i32) {
    %c0_i32 = arith.constant 0 : i32
    %c0_i32_0 = arith.constant 0 : i32
    %c0_i32_1 = arith.constant 0 : i32
    return %c0_i32, %c0_i32_0 : i32, i32
  }
  func.func @transform_2(%arg0: i32) -> (i32, i32) {
    %c0_i32 = arith.constant 0 : i32
    %c0_i32_0 = arith.constant 0 : i32
    %c0_i32_1 = arith.constant 0 : i32
    return %c0_i32, %c0_i32_0 : i32, i32
  }
  func.func @transform_3(%arg0: i32) -> (i32, i32) {
    %c0_i32 = arith.constant 0 : i32
    %c0_i32_0 = arith.constant 0 : i32
    %c0_i32_1 = arith.constant 0 : i32
    return %c0_i32, %c0_i32_0 : i32, i32
  }
  func.func @transform_4(%arg0: i32) -> (i32, i32) {
    %c0_i32 = arith.constant 0 : i32
    %c0_i32_0 = arith.constant 0 : i32
    %c0_i32_1 = arith.constant 0 : i32
    return %c0_i32, %c0_i32_0 : i32, i32
  }
  func.func @transform_5(%arg0: i32) -> (i32, i32) {
    %c0_i32 = arith.constant 0 : i32
    %c0_i32_0 = arith.constant 0 : i32
    return %arg0, %c0_i32 : i32, i32
  }
}

</mosaic_0001>

<bundles_post_ra>
// kernel: mlp_forward.1
= control target key start
LH: loop header
LB: loop body
LE: loop exit
PB: predicated region body
PF: predicated region fallthrough
CT: control target
= control target key end

     0   :  { %v357_v7 = vmov 0.0   ;;  %vm42_vm0 = vcmask 261120   ;;  %s532_s0 = inlined_call_operand.vmem [shape: f32[8,32], index: 0, kind: input, shape index: {}]   ;;  %s533_s1 = inlined_call_operand.vmem [shape: f32[32,256], index: 1, kind: input, shape index: {}]   ;;  %s534_s2 = inlined_call_operand.vmem [shape: f32[1,256], index: 2, kind: input, shape index: {}]   ;;  %s535_s3 = inlined_call_operand.vmem [shape: f32[256,32], index: 3, kind: input, shape index: {}]   ;;  %s536_s4 = inlined_call_operand.vmem [shape: f32[1,32], index: 4, kind: input, shape index: {}]   ;;  %s537_s5 = inlined_call_operand.hbm [shape: f32[8,32], index: 5, kind: output, shape index: {}]  }
   0x1   :  { %v23_v0 = vld [vmem:[%s533_s1 + $0x8] sm:$0xff]  ;;  %v25_v1 = vld [vmem:[%s533_s1 + $0x18] sm:$0xff]  ;;  %v22_v2 = vld [vmem:[%s533_s1] sm:$0xff]  ;;  %110 = vmatprep.mubr.f32.mxu0 %v357_v7 }
   0x2   :  { %v287_v3 = vpack.c.bf16 %v25_v1, %v23_v0  ;;  %v24_v4 = vld [vmem:[%s533_s1 + $0x10] sm:$0xff]  ;;  %v27_v5 = vld [vmem:[%s533_s1 + $0x28] sm:$0xff]  ;;  %v29_v6 = vld [vmem:[%s533_s1 + $0x38] sm:$0xff] }
   0x3   :  { %v289_v8 = vpack.c.bf16 %v24_v4, %v22_v2  ;;  %v291_v9 = vpack.c.bf16 %v29_v6, %v27_v5  ;;  %v26_v10 = vld [vmem:[%s533_s1 + $0x20] sm:$0xff]  ;;  %v28_v11 = vld [vmem:[%s533_s1 + $0x30] sm:$0xff]  ;;  %v136_v13 = vld [vmem:[%s535_s3 + $0x88] sm:$0xff] }
   0x4   :  { %288 = vmatprep.subr.bf16.mxu0 %v287_v3  ;;  %v135_v12 = vld [vmem:[%s535_s3 + $0x80] sm:$0xff]  ;;  %v293_v15 = vpack.c.bf16 %v28_v11, %v26_v10  ;;  %v120_v17 = vld [vmem:[%s535_s3 + $0x8] sm:$0xff]  ;;  %v137_v18 = vld [vmem:[%s535_s3 + $0x90] sm:$0xff] }
   0x5   :  { %v119_v14 = vld [vmem:[%s535_s3] sm:$0xff]  ;;  %290 = vmatpush1.bf16.msra.mxu0 %v289_v8  ;;  %v295_v16 = vpack.c.bf16 %v136_v13, %v135_v12  ;;  %v138_v19 = vld [vmem:[%s535_s3 + $0x98] sm:$0xff]  ;;  %v121_v22 = vld [vmem:[%s535_s3 + $0x10] sm:$0xff] }
   0x6   :  { %292 = vmatprep.subr.bf16.mxu0 %v291_v9  ;;  %v297_v20 = vpack.c.bf16 %v120_v17, %v119_v14  ;;  %v299_v21 = vpack.c.bf16 %v138_v19, %v137_v18  ;;  %v122_v23 = vld [vmem:[%s535_s3 + $0x18] sm:$0xff]  ;;  %v139_v24 = vld [vmem:[%s535_s3 + $0xa0] sm:$0xff]  ;;  %v140_v25 = vld [vmem:[%s535_s3 + $0xa8] sm:$0xff] }
   0x7   :  { %296 = vmatprep.subr.bf16.mxu1 %v295_v16  ;;  %v301_v26 = vpack.c.bf16 %v122_v23, %v121_v22  ;;  %v21_v27 = vld [vmem:[%s532_s0] sm:$0xff]  ;;  %v303_v28 = vpack.c.bf16 %v140_v25, %v139_v24  ;;  %v124_v30 = vld [vmem:[%s535_s3 + $0x28] sm:$0xff]  ;;  %v141_v31 = vld [vmem:[%s535_s3 + $0xb0] sm:$0xff] }
   0x8   :  { %298 = vmatpush3.bf16.msra.mxu1 %v297_v20  ;;  %v123_v29 = vld [vmem:[%s535_s3 + $0x20] sm:$0xff]  ;;  %v142_v32 = vld [vmem:[%s535_s3 + $0xb8] sm:$0xff]  ;;  %v125_v35 = vld [vmem:[%s535_s3 + $0x30] sm:$0xff] }
   0x9   :  { %294 = vmatpush1.bf16.msra.mxu0 %v293_v15  ;;  %300 = vmatprep.subr.bf16.mxu1 %v299_v21  ;;  %v305_v33 = vpack.c.bf16 %v124_v30, %v123_v29  ;;  %v307_v34 = vpack.c.bf16 %v142_v32, %v141_v31  ;;  %v126_v36 = vld [vmem:[%s535_s3 + $0x38] sm:$0xff] }
   0xc   :  { %249 = vmatmul.mubr.msk.f32.vlgmr.msra.gmra.mrb[0].mxu0 %vm42_vm0, %v21_v27  ;;  %302 = vmatpush3.bf16.msra.mxu1 %v301_v26 }
   0xd   :  { %304 = vmatprep.subr.bf16.mxu1 %v303_v28 }
   0xe   :  { %10 = vsyncpa [#allocation3], 0  ;;  %v143_v37 = vld [vmem:[%s535_s3 + $0xc0] sm:$0xff]  ;;  %v144_v38 = vld [vmem:[%s535_s3 + $0xc8] sm:$0xff]  ;;  %v309_v39 = vpack.c.bf16 %v126_v36, %v125_v35  ;;  %v32_v62 = vlaneseq }
   0xf   :  { %v311_v40 = vpack.c.bf16 %v144_v38, %v143_v37  ;;  %v127_v41 = vld [vmem:[%s535_s3 + $0x40] sm:$0xff]  ;;  %v128_v42 = vld [vmem:[%s535_s3 + $0x48] sm:$0xff]  ;;  %v145_v43 = vld [vmem:[%s535_s3 + $0xd0] sm:$0xff] }
  0x10   :  { %306 = vmatpush3.bf16.msra.mxu1 %v305_v33  ;;  %v146_v44 = vld [vmem:[%s535_s3 + $0xd8] sm:$0xff]  ;;  %v313_v45 = vpack.c.bf16 %v128_v42, %v127_v41  ;;  %v129_v47 = vld [vmem:[%s535_s3 + $0x50] sm:$0xff]  ;;  %v147_v49 = vld [vmem:[%s535_s3 + $0xe0] sm:$0xff]  ;;  %v33_v63 = vshrl.u32 %v32_v62, 7 }
  0x11   :  { %308 = vmatprep.subr.bf16.mxu1 %v307_v34  ;;  %v315_v46 = vpack.c.bf16 %v146_v44, %v145_v43  ;;  %v130_v48 = vld [vmem:[%s535_s3 + $0x58] sm:$0xff]  ;;  %v148_v50 = vld [vmem:[%s535_s3 + $0xe8] sm:$0xff]  ;;  %v131_v53 = vld [vmem:[%s535_s3 + $0x60] sm:$0xff] }
  0x12   :  { %v317_v51 = vpack.c.bf16 %v130_v48, %v129_v47  ;;  %v319_v52 = vpack.c.bf16 %v148_v50, %v147_v49  ;;  %v132_v54 = vld [vmem:[%s535_s3 + $0x68] sm:$0xff]  ;;  %v149_v56 = vld [vmem:[%s535_s3 + $0xf0] sm:$0xff]  ;;  %v150_v57 = vld [vmem:[%s535_s3 + $0xf8] sm:$0xff]  ;;  %v34_v0 = vsub.s32 0, %v33_v63  ;;  %v38_v2 = vsub.s32 1, %v33_v63 }
  0x13   :  { %v321_v55 = vpack.c.bf16 %v132_v54, %v131_v53  ;;  %v323_v58 = vpack.c.bf16 %v150_v57, %v149_v56  ;;  %v133_v59 = vld [vmem:[%s535_s3 + $0x70] sm:$0xff]  ;;  %v134_v60 = vld [vmem:[%s535_s3 + $0x78] sm:$0xff]  ;;  %v30_v1 = vld [vmem:[%s534_s2] sm:$0x3]  ;;  %s358_s2 = smov [#allocation2]  }
  0x14   :  { %310 = vmatpush3.bf16.msra.mxu1 %v309_v39  ;;  %v325_v61 = vpack.c.bf16 %v134_v60, %v133_v59  ;;  %v35_v3 = vrot.slane %v30_v1, %v34_v0  ;;  %v39_v4 = vrot.slane %v30_v1, %v38_v2  ;;  %v250_v12 = vld [vmem:[%s536_s4] ss:$0 sm:$0xff]  ;;  %s241_s23 = sshll.u32 %s358_s2, 4  ;;  %s242_s23 = int_to_ptr.vmem [resolvable:$true] %s241_s23 }
  0x15   :  { %312 = vmatprep.subr.bf16.mxu1 %v311_v40  ;;  %s333_s24 = scalar_lea.vmem %s242_s23, 128  ;;  %p338_p1 = scmp.lt.s32.totalorder %s242_s23, %s242_s23 }
  0x16   :  { %p334_p0 = scmp.ne.s32.totalorder %s242_s23, %s333_s24  ;;  %p339_p2 = scmp.lt.s32.totalorder %s333_s24, %s333_s24 }
  0x18   :  { %314 = vmatpush3.bf16.msra.mxu1 %v313_v45  ;;  %p340_p3 = por %p339_p2, %p338_p1 }
  0x19   :  { %316 = vmatprep.subr.bf16.mxu1 %v315_v46 }
  0x1a   :  { %p341_p4 = pnand %p340_p3, %p334_p0 }
  0x1c   :  { %318 = vmatpush3.bf16.msra.mxu1 %v317_v51 }
  0x1d   :  { %320 = vmatprep.subr.bf16.mxu1 %v319_v52 }
  0x20   :  { %322 = vmatpush3.bf16.msra.mxu1 %v321_v55 }
  0x21   :  { %324 = vmatprep.subr.bf16.mxu1 %v323_v58 }
  0x24   :  { %326 = vmatpush3.bf16.msra.mxu1 %v325_v61 }
  0xdf   :  { %v112_v5 = vpop.f32.mrb[0].mxu0 }
  0xe0   :  { %v113_v6 = vadd.f32 %v112_v5, %v35_v3  ;;  %v114_v7 = vpop.f32.mrb[1].mxu0 }
  0xe1   :  { %v115_v8 = vadd.f32 %v114_v7, %v39_v4 }
  0xe2   :  { %v117_v10 = vmax.f32 %v113_v6, 0.0 }
  0xe3   :  { %v118_v9 = vmax.f32 %v115_v8, 0.0 }
  0xe5   :  { %222 = vmatprep.mubr.f32.mxu1 %v118_v9 }
  0xe6   :  { %223 = vmatmul.mubr.f32.vlgmr.msra.gmra.mrb[0].mxu1 %v117_v10 }
 0x1b9   :  { %v284_v11 = vpop.f32.mrb[0].mxu1 }
 0x1ba   :  { %v285_v13 = vpop.f32.mrb[1].mxu1 }
 0x1bb   :  { %v286_v14 = vadd.f32 %v285_v13, %v284_v11 }
 0x1bd   :  { %v225_v15 = vadd.f32 %v286_v14, %v250_v12 }
 0x1bf   :  { %v251_v16 = vmul.f32 -1.442695, %v225_v15 }
 0x1c1   :  { %329 = vpow2.f32 %v251_v16 }
 0x1cb   :  { %v330_v17 = vpop.eup %329 }
 0x1cc   :  { %v231_v18 = vadd.f32 1.0, %v330_v17 }
 0x1ce   :  { %331 = vrcp.f32 %v231_v18 }
 0x1d8   :  { %v332_v19 = vpop.eup %331 }
 0x1d9   :  { %234 = vst.msk [vmem:[#allocation2] sm:$0xff] %vm42_vm0, %v332_v19 }
 0x1da   :  { %344 = shalt.err (!%p341_p4)
}
 0x1db   :  { %s345_s26 = scalar_lea.hbm %s537_s5, 128 }
 0x1dc   :  { %p346_p5 = scmp.ne.s32.totalorder %s537_s5, %s345_s26  ;;  %p349_p6 = scmp.lt.u32.totalorder %s345_s26, %s537_s5 }
 0x1de   :  { %p351_p7 = pnand %p349_p6, %p346_p5 }
 0x1e0   :  { %354 = shalt.err (!%p351_p7)
}
 0x1e1   :  { %244 = dma.vmem_to_hbm [thread:$0]  %s242_s23, 128, %s537_s5, [#allocation3]  }
 0x1e2   :  { %355 = dma.done.wait [#allocation3], 128  }
 0x1e3   :  { %356 = vsyncadd [#allocation3], 4294967168 }
 0x1e4   :  { %248 = vsyncpa [#allocation3], 1 }

</bundles_post_ra>
